<compile_context>
chip_gen: v7x
topology: tpu7x:2x2x1
jax: 0.10.0
libtpu: 0.0.40
codegen_flags: <defaults>
</compile_context>

<pallas_src>
import functools

import numpy as np
import jax
import jax.numpy as jnp
from jax.experimental import pallas as pl
from jax.experimental.pallas import tpu as pltpu


# ---------------------------------------------------------------------------
# Host-side (trace-time) construction of reflect-padded blur operators.
# ---------------------------------------------------------------------------
def _gaussian_kernel1d(ksize):
    # torchvision.gaussian_blur with sigma=None: sigma = 0.3*((k-1)*0.5 - 1) + 0.8
    sigma = 0.3 * ((ksize - 1) * 0.5 - 1.0) + 0.8
    half = (ksize - 1) * 0.5
    xs = np.linspace(-half, half, ksize)
    pdf = np.exp(-0.5 * (xs / sigma) ** 2)
    return pdf / pdf.sum()


def _reflect_idx(p, n):
    if n == 1:
        return 0
    period = 2 * (n - 1)
    p = abs(p) % period
    return period - p if p >= n else p


def _blur_matrix(n, ksize):
    """M (f64) such that (M @ s) == reflect-padded 1-D Gaussian blur of signal s."""
    k = _gaussian_kernel1d(ksize)
    r = ksize // 2
    m = np.zeros((n, n), dtype=np.float64)
    for i in range(n):
        for j in range(ksize):
            m[i, _reflect_idx(i - r + j, n)] += k[j]
    return m


def _make_operators(H, W, k_low, k_high, use_kron):
    mwl = _blur_matrix(W, k_low)
    mwh = _blur_matrix(W, k_high)
    mhl = _blur_matrix(H, k_low)
    mhh = _blur_matrix(H, k_high)
    if use_kron:
        # Combined "blur_low - blur_high" operator on the row-major flattened image:
        # dog_vec = A @ x_vec  ->  dog_rows = x_rows @ A.T
        a = np.kron(mhl, mwl) - np.kron(mhh, mwh)          # (H*W, H*W)
        return (jnp.asarray(a.T.astype(np.float32)),)
    # Separable path: fused W-blur  [lo | hi]  and fused H-blur-with-subtract [lo ; -hi].
    mw = np.concatenate([mwl.T, mwh.T], axis=1)            # (W, 2W)
    mh = np.concatenate([mhl.T, -mhh.T], axis=0)           # (2H, H)
    return (jnp.asarray(mw.astype(np.float32)), jnp.asarray(mh.astype(np.float32)))


# ---------------------------------------------------------------------------
# Shared in-kernel DoG computation (trace-time choice of operator form).
# ---------------------------------------------------------------------------
def _dog_from_tile(x, mats, use_kron):
    """x: (bt, C, H, W) float32 -> DoG as (bt*C, H*W) float32."""
    bt, c, h, w = x.shape
    n = bt * c
    if use_kron:
        m = mats[0]                                        # (H*W, H*W)
        return jnp.dot(x.reshape(n, h * w), m, preferred_element_type=jnp.float32)

    mw, mh = mats                                          # (W, 2W), (2H, H)
    # Fused W-blur: one matmul produces [low | high] along the lane dim.
    aw = jnp.dot(x.reshape(n * h, w), mw, preferred_element_type=jnp.float32)
    lo = jnp.swapaxes(aw[:, :w].reshape(n, h, w), 1, 2)    # (n, w, h)
    hi = jnp.swapaxes(aw[:, w:].reshape(n, h, w), 1, 2)    # (n, w, h)
    # Fused H-blur + subtraction: contract over the concatenated 2H axis.
    acat = jnp.concatenate([lo, hi], axis=2).reshape(n * w, 2 * h)
    d = jnp.dot(acat, mh, preferred_element_type=jnp.float32)   # (n*w, h)
    # TODO(synk): for very large H/W, replace the dense (H,H)/(W,W) operators with
    # banded matrices or a pltpu.roll + FMA formulation (dense is O(H) MACs per tap).
    return jnp.swapaxes(d.reshape(n, w, h), 1, 2).reshape(n, h * w)


def _gamma_gain_clamp(xn, gamma, gain):
    if gamma == 1.0:                                       # static specialization
        g = xn
    else:
        g = jnp.where(xn > 0.0,
                      jnp.exp(gamma * jnp.log(jnp.maximum(xn, 1e-30))),
                      jnp.float32(0.0))
    return jnp.clip(gain * g, 0.0, 1.0)


# ---------------------------------------------------------------------------
# Kernel 1: fully fused path (whole batch in one block) -> 2 HBM passes total.
# ---------------------------------------------------------------------------
def _fused_kernel(*refs, use_kron, gamma, gain):
    nmat = 1 if use_kron else 2
    x_ref = refs[0]
    mats = tuple(r[...] for r in refs[1:1 + nmat])
    o_ref = refs[1 + nmat]

    x = x_ref[...].astype(jnp.float32)                     # upcast in-kernel (no host pass)
    dog = _dog_from_tile(x, mats, use_kron)                # (B*C, H*W)

    mn = jnp.min(jnp.min(dog, axis=1, keepdims=True), axis=0, keepdims=True)
    mx = jnp.max(jnp.max(dog, axis=1, keepdims=True), axis=0, keepdims=True)
    rng = mx - mn
    inv = jnp.where(rng > 0.0, 1.0 / rng, 0.0)             # rng==0 -> zeros (see header)
    o_ref[...] = _gamma_gain_clamp((dog - mn) * inv, gamma, gain)


# ---------------------------------------------------------------------------
# Kernel 2 (blocked path): per-block DoG + per-block partial min/max ("parallel").
# ---------------------------------------------------------------------------
def _dog_block_kernel(*refs, use_kron):
    nmat = 1 if use_kron else 2
    x_ref = refs[0]
    mats = tuple(r[...] for r in refs[1:1 + nmat])
    dog_ref, mn_ref, mx_ref = refs[1 + nmat:1 + nmat + 3]

    x = x_ref[...].astype(jnp.float32)
    dog = _dog_from_tile(x, mats, use_kron)
    dog_ref[...] = dog.reshape(dog_ref.shape)

    mn11 = jnp.min(jnp.min(dog, axis=1, keepdims=True), axis=0, keepdims=True)
    mx11 = jnp.max(jnp.max(dog, axis=1, keepdims=True), axis=0, keepdims=True)
    # Lane-dense broadcast tiles (unmasked stores) instead of 1x1 masked stores.
    mn_ref[...] = jnp.broadcast_to(mn11, mn_ref.shape)
    mx_ref[...] = jnp.broadcast_to(mx11, mx_ref.shape)


# ---------------------------------------------------------------------------
# Kernel 3 (blocked path): fused normalize + gamma + clamp, in place.
# ---------------------------------------------------------------------------
def _norm_gamma_kernel(sb_ref, d_ref, o_ref, *, gamma, gain):
    xn = d_ref[...] * sb_ref[0] + sb_ref[1]                # normalize_in_range(d, 0, 1)
    o_ref[...] = _gamma_gain_clamp(xn, gamma, gain)


# ---------------------------------------------------------------------------
# Wrapper.
# ---------------------------------------------------------------------------
_WORKSET_MULT = 10       # ~f32 copy + matmul intermediates + dog + double-buffered in/out


def _vmem_capacity_bytes():
    try:
        info = pltpu.get_tpu_info()
        for attr in ("vmem_capacity_bytes", "vmem_bytes", "vmem_size_bytes"):
            v = getattr(info, attr, None)
            if v:
                return int(v)
    except Exception:
        pass
    return 64 * 1024 * 1024      # conservative default (v7x per-core VMEM)


def _diff_of_gaus_pallas(x, *, kernel_low, kernel_high, gamma, gain,
                         force_blocked=False, force_separable=False,
                         max_block_bytes=None):
    B, C, H, W = x.shape
    hw = H * W
    gamma = float(gamma)
    gain = float(gain)

    vmem_cap = _vmem_capacity_bytes()
    vmem_limit = int(min(96 * 1024 * 1024, max(32 * 1024 * 1024, 0.75 * vmem_cap)))

    use_kron = (hw <= 1024) and not force_separable
    mats = _make_operators(H, W, kernel_low, kernel_high, use_kron)
    mat_bytes = sum(int(np.prod(m.shape)) * 4 for m in mats)

    # ---- batch-block sizing against the real per-step working set -------------
    if max_block_bytes is None:
        max_block_bytes = (4 << 20) if vmem_cap >= (100 << 20) else (2 << 20)
    per_img_f32 = C * hw * 4
    budget = max(per_img_f32, max(vmem_limit - 2 * mat_bytes, 0) // _WORKSET_MULT)
    budget = min(budget, max_block_bytes)
    bt = max(1, min(B, budget // per_img_f32))
    while B % bt:
        bt -= 1

    mat_specs_fused = [pl.BlockSpec(m.shape, lambda i: (0, 0)) for m in mats]
    mat_specs_block = [pl.BlockSpec(m.shape, lambda b: (0, 0)) for m in mats]

    # =========================== fused single-pass path ========================
    if bt == B and not force_blocked:
        out2d = pl.pallas_call(
            functools.partial(_fused_kernel, use_kron=use_kron, gamma=gamma, gain=gain),
            out_shape=jax.ShapeDtypeStruct((B * C, hw), jnp.float32),
            grid_spec=pltpu.PrefetchScalarGridSpec(
                num_scalar_prefetch=0,
                grid=(1,),
                in_specs=[pl.BlockSpec((B, C, H, W), lambda i: (0, 0, 0, 0))]
                         + mat_specs_fused,
                out_specs=pl.BlockSpec((B * C, hw), lambda i: (0, 0))),
            compiler_params=pltpu.CompilerParams(
                dimension_semantics=("arbitrary",),
                vmem_limit_bytes=vmem_limit),
        )(x, *mats)
        return out2d.reshape(B, C, H, W).astype(x.dtype)

    # ============================== blocked path ===============================
    num_blocks = B // bt

    lane_dense = (C * hw) % 128 == 0 and (bt * C * hw // 128) % 8 == 0
    if lane_dense:
        per = C * hw // 128
        dog_shape = (B * per, 128)
        dog_block = (bt * per, 128)
        dog_idx = lambda b: (b, 0)
    else:
        dog_shape = (B, C, H, W)
        dog_block = (bt, C, H, W)
        dog_idx = lambda b: (b, 0, 0, 0)

    stat_shape = (num_blocks, 8, 128)
    stat_spec = pl.BlockSpec((1, 8, 128), lambda b: (b, 0, 0))

    dog, mn_t, mx_t = pl.pallas_call(
        functools.partial(_dog_block_kernel, use_kron=use_kron),
        out_shape=(jax.ShapeDtypeStruct(dog_shape, jnp.float32),
                   jax.ShapeDtypeStruct(stat_shape, jnp.float32),
                   jax.ShapeDtypeStruct(stat_shape, jnp.float32)),
        grid_spec=pltpu.PrefetchScalarGridSpec(
            num_scalar_prefetch=0,
            grid=(num_blocks,),
            in_specs=[pl.BlockSpec((bt, C, H, W), lambda b: (b, 0, 0, 0))]
                     + mat_specs_block,
            out_specs=(pl.BlockSpec(dog_block, dog_idx), stat_spec, stat_spec)),
        compiler_params=pltpu.CompilerParams(
            dimension_semantics=("parallel",),      # per-block partials -> both v7x cores
            vmem_limit_bytes=vmem_limit),
    )(x, *mats)

    # Scalar glue: global min/max -> one affine (scale, bias) for normalize_in_range.
    mn = jnp.min(mn_t)
    mx = jnp.max(mx_t)
    rng = mx - mn
    inv = jnp.where(rng > 0, 1.0 / rng, 0.0)
    sb = jnp.stack([inv, -mn * inv]).astype(jnp.float32)   # (2,): scale, bias

    d2 = dog if lane_dense else dog.reshape(B * C, hw)
    rows, cols = d2.shape

    cap_bytes = (4 << 20) if vmem_cap >= (100 << 20) else (2 << 20)
    cap_rows = max(8, (cap_bytes // (cols * 4) // 8) * 8)
    rt = rows if rows <= cap_rows else cap_rows            # partial tail handled by masking
    grid_b = pl.cdiv(rows, rt)

    out2d = pl.pallas_call(
        functools.partial(_norm_gamma_kernel, gamma=gamma, gain=gain),
        out_shape=jax.ShapeDtypeStruct((rows, cols), jnp.float32),
        grid_spec=pltpu.PrefetchScalarGridSpec(
            num_scalar_prefetch=0,
            grid=(grid_b,),
            in_specs=[pl.BlockSpec(memory_space=pltpu.MemorySpace.SMEM),   # (2,) scale/bias
                      pl.BlockSpec((rt, cols), lambda r: (r, 0))],
            out_specs=pl.BlockSpec((rt, cols), lambda r: (r, 0))),
        input_output_aliases={1: 0},                       # normalize in place (no new HBM buffer)
        compiler_params=pltpu.CompilerParams(
            dimension_semantics=("parallel",),
            vmem_limit_bytes=vmem_limit),
    )(sb, d2)

    return out2d.reshape(B, C, H, W).astype(x.dtype)


class DiffOfGaus:
    """Pallas/JAX port of the PyTorch DiffOfGaus module (NCHW float images)."""

    def __init__(self, low_sigma, high_sigma, truncate=4.0, gamma=1.0, gain=1.0,
                 force_blocked=False, force_separable=False, max_block_bytes=None):
        radius_low = round(truncate * low_sigma)
        radius_high = round(truncate * high_sigma)
        self.kernel_low = 2 * radius_low + 1
        self.kernel_high = 2 * radius_high + 1
        self.gamma = gamma
        self.gain = gain
        self._fwd = jax.jit(functools.partial(
            _diff_of_gaus_pallas,
            kernel_low=self.kernel_low, kernel_high=self.kernel_high,
            gamma=float(gamma), gain=float(gain),
            force_blocked=force_blocked, force_separable=force_separable,
            max_block_bytes=max_block_bytes))

    def __call__(self, t):
        x, y = t[0], t[1]
        return (self._fwd(x), y)


# ---------------------------------------------------------------------------
# Independent numpy reference (np.pad reflect + explicit 1-D convolutions).
# ---------------------------------------------------------------------------
def _reference_numpy(x, kernel_low, kernel_high, gamma, gain):
    x = np.asarray(x, dtype=np.float64)

    def blur(a, ksize):
        k = _gaussian_kernel1d(ksize)
        r = ksize // 2
        out = a
        for axis in (2, 3):
            pad = [(0, 0)] * out.ndim
            pad[axis] = (r, r)
            ap = np.pad(out, pad, mode="reflect")
            acc = np.zeros_like(out)
            for j in range(ksize):
                sl = [slice(None)] * out.ndim
                sl[axis] = slice(j, j + out.shape[axis])
                acc = acc + k[j] * ap[tuple(sl)]
            out = acc
        return out

    d = blur(x, kernel_low) - blur(x, kernel_high)
    mn, mx = d.min(), d.max()
    d = (d - mn) / (mx - mn) if mx > mn else np.zeros_like(d)
    return np.clip(gain * np.power(d, gamma), 0.0, 1.0)


if __name__ == "__main__":
    key = jax.random.PRNGKey(0)
    kx, ky = jax.random.split(key)
    # x: image batch (NCHW), y: passthrough target (returned unchanged).
    x = jax.random.uniform(kx, (2, 4, 16, 16), dtype=jnp.float32)
    y = (jax.random.uniform(ky, (2, 1, 16, 16)) > 0.5).astype(jnp.float32)

    # low_sigma=1 -> kernel 9 (pad 4), high_sigma=2 -> kernel 17 (pad 8); both < 16.
    mod = DiffOfGaus(low_sigma=1.0, high_sigma=2.0, truncate=4.0, gamma=1.2, gain=1.0)
    out_x, out_y = mod((x, y))
    jax.block_until_ready((out_x, out_y))

    assert out_x.shape == x.shape and out_x.dtype == jnp.float32, out_x.shape
    assert out_y.shape == y.shape and bool(jnp.all(out_y == y))
    assert bool(jnp.all(jnp.isfinite(out_x)))
    assert float(jnp.min(out_x)) >= 0.0 and float(jnp.max(out_x)) <= 1.0

    # Validate against an independent f64 numpy reference.
    ref = _reference_numpy(np.asarray(x), mod.kernel_low, mod.kernel_high, 1.2, 1.0)
    np.testing.assert_allclose(np.asarray(out_x), ref, rtol=2e-4, atol=2e-4)

    # Exercise the blocked path (per-block partial min/max + in-place normalize pass).
    mod_blocked = DiffOfGaus(low_sigma=1.0, high_sigma=2.0, truncate=4.0,
                             gamma=1.2, gain=1.0,
                             force_blocked=True, max_block_bytes=4 * 16 * 16 * 4)
    out_b, _ = mod_blocked((x, y))
    np.testing.assert_allclose(np.asarray(out_b), np.asarray(out_x), rtol=1e-5, atol=1e-5)

    # Exercise the separable (large-image) operator path and cross-check.
    mod_sep = DiffOfGaus(low_sigma=1.0, high_sigma=2.0, truncate=4.0,
                         gamma=1.2, gain=1.0, force_separable=True)
    out_s, _ = mod_sep((x, y))
    np.testing.assert_allclose(np.asarray(out_s), np.asarray(out_x), rtol=2e-4, atol=2e-4)

    print("KERNEL_OK")
</pallas_src>

<mosaic_0001>
module attributes {stable_mosaic.version = 11 : i64} {
  func.func @_fused_kernel(%arg0: i32, %arg1: memref<2x4x16x16xf32, #tpu.memory_space<vmem>>, %arg2: memref<256x256xf32, #tpu.memory_space<vmem>>, %arg3: memref<8x256xf32, #tpu.memory_space<vmem>>) attributes {dimension_semantics = [#tpu.dimension_semantics<arbitrary>], iteration_bounds = array<i64: 1>, scalar_prefetch = 0 : i64, scratch_operands = 0 : i64, tpu.core_type = #tpu.core_type<tc>, window_params = [{pipeline_mode = #tpu.pipeline_mode<synchronous>, transform_indices = @transform_0, window_bounds = array<i64: 2, 4, 16, 16>}, {pipeline_mode = #tpu.pipeline_mode<synchronous>, transform_indices = @transform_1, window_bounds = array<i64: 256, 256>}, {pipeline_mode = #tpu.pipeline_mode<synchronous>, transform_indices = @transform_2, window_bounds = array<i64: 8, 256>}]} {
    %c0 = arith.constant 0 : index
    %c0_0 = arith.constant 0 : index
    %0 = vector.load %arg2[%c0, %c0_0] : memref<256x256xf32, #tpu.memory_space<vmem>>, vector<256x256xf32>
    %c0_1 = arith.constant 0 : index
    %c0_2 = arith.constant 0 : index
    %c0_3 = arith.constant 0 : index
    %c0_4 = arith.constant 0 : index
    %1 = vector.load %arg1[%c0_1, %c0_2, %c0_3, %c0_4] : memref<2x4x16x16xf32, #tpu.memory_space<vmem>>, vector<2x4x16x16xf32>
    %2 = vector.shape_cast %1 : vector<2x4x16x16xf32> to vector<8x256xf32>
    %cst = arith.constant dense<0.000000e+00> : vector<8x256xf32>
    %3 = tpu.matmul %2, %0, %cst {dimension_numbers = #tpu.dot_dimension_numbers<[1], [0], [0], [1], [0, 0, 1, 1], [], []>} : vector<8x256xf32>, vector<256x256xf32>, vector<8x256xf32> -> vector<8x256xf32>
    %cst_5 = arith.constant dense<0x7F800000> : vector<8xf32>
    %4 = vector.multi_reduction <minimumf>, %3, %cst_5 [1] : vector<8x256xf32> to vector<8xf32>
    %5 = vector.shape_cast %4 : vector<8xf32> to vector<8x1xf32>
    %cst_6 = arith.constant dense<0x7F800000> : vector<1xf32>
    %6 = vector.multi_reduction <minimumf>, %5, %cst_6 [0] : vector<8x1xf32> to vector<1xf32>
    %7 = vector.shape_cast %6 : vector<1xf32> to vector<1x1xf32>
    %cst_7 = arith.constant dense<0xFF800000> : vector<8xf32>
    %8 = vector.multi_reduction <maximumf>, %3, %cst_7 [1] : vector<8x256xf32> to vector<8xf32>
    %9 = vector.shape_cast %8 : vector<8xf32> to vector<8x1xf32>
    %cst_8 = arith.constant dense<0xFF800000> : vector<1xf32>
    %10 = vector.multi_reduction <maximumf>, %9, %cst_8 [0] : vector<8x1xf32> to vector<1xf32>
    %11 = vector.shape_cast %10 : vector<1xf32> to vector<1x1xf32>
    %12 = arith.subf %11, %7 : vector<1x1xf32>
    %cst_9 = arith.constant 0.000000e+00 : f32
    %13 = vector.broadcast %cst_9 : f32 to vector<1x1xf32>
    %14 = arith.cmpf ogt, %12, %13 : vector<1x1xf32>
    %cst_10 = arith.constant 1.000000e+00 : f32
    %15 = vector.broadcast %cst_10 : f32 to vector<1x1xf32>
    %16 = arith.divf %15, %12 : vector<1x1xf32>
    %cst_11 = arith.constant 0.000000e+00 : f32
    %17 = vector.broadcast %cst_11 : f32 to vector<1x1xf32>
    %18 = arith.select %14, %16, %17 : vector<1x1xi1>, vector<1x1xf32>
    %19 = vector.broadcast %7 : vector<1x1xf32> to vector<8x256xf32>
    %20 = arith.subf %3, %19 : vector<8x256xf32>
    %21 = vector.broadcast %18 : vector<1x1xf32> to vector<8x256xf32>
    %22 = arith.mulf %20, %21 : vector<8x256xf32>
    %cst_12 = arith.constant 0.000000e+00 : f32
    %23 = vector.broadcast %cst_12 : f32 to vector<8x256xf32>
    %24 = arith.cmpf ogt, %22, %23 : vector<8x256xf32>
    %cst_13 = arith.constant 1.000000e-30 : f32
    %25 = vector.broadcast %cst_13 : f32 to vector<8x256xf32>
    %26 = arith.maximumf %22, %25 : vector<8x256xf32>
    %27 = math.log %26 : vector<8x256xf32>
    %cst_14 = arith.constant 1.200000e+00 : f32
    %28 = vector.broadcast %cst_14 : f32 to vector<8x256xf32>
    %29 = arith.mulf %28, %27 : vector<8x256xf32>
    %30 = math.exp %29 : vector<8x256xf32>
    %cst_15 = arith.constant 0.000000e+00 : f32
    %31 = vector.broadcast %cst_15 : f32 to vector<8x256xf32>
    %32 = arith.select %24, %30, %31 : vector<8x256xi1>, vector<8x256xf32>
    %cst_16 = arith.constant 1.000000e+00 : f32
    %33 = vector.broadcast %cst_16 : f32 to vector<8x256xf32>
    %34 = arith.mulf %33, %32 : vector<8x256xf32>
    %cst_17 = arith.constant 0.000000e+00 : f32
    %cst_18 = arith.constant 1.000000e+00 : f32
    %35 = vector.broadcast %cst_17 : f32 to vector<8x256xf32>
    %36 = arith.maximumf %35, %34 : vector<8x256xf32>
    %37 = vector.broadcast %cst_18 : f32 to vector<8x256xf32>
    %38 = arith.minimumf %37, %36 : vector<8x256xf32>
    %c0_19 = arith.constant 0 : index
    %c0_20 = arith.constant 0 : index
    %39 = vector.load %arg3[%c0_19, %c0_20] : memref<8x256xf32, #tpu.memory_space<vmem>>, vector<8x256xf32>
    tpu.vector_store %arg3[%c0_19, %c0_20], %38 {strides = array<i32>} : memref<8x256xf32, #tpu.memory_space<vmem>>, vector<8x256xf32>,
    return
  }
  func.func @transform_0(%arg0: i32) -> (i32, i32, i32, i32) {
    %c0_i32 = arith.constant 0 : i32
    %c0_i32_0 = arith.constant 0 : i32
    %c0_i32_1 = arith.constant 0 : i32
    %c0_i32_2 = arith.constant 0 : i32
    %c0_i32_3 = arith.constant 0 : i32
    return %c0_i32, %c0_i32_0, %c0_i32_1, %c0_i32_2 : i32, i32, i32, i32
  }
  func.func @transform_1(%arg0: i32) -> (i32, i32) {
    %c0_i32 = arith.constant 0 : i32
    %c0_i32_0 = arith.constant 0 : i32
    %c0_i32_1 = arith.constant 0 : i32
    return %c0_i32, %c0_i32_0 : i32, i32
  }
  func.func @transform_2(%arg0: i32) -> (i32, i32) {
    %c0_i32 = arith.constant 0 : i32
    %c0_i32_0 = arith.constant 0 : i32
    %c0_i32_1 = arith.constant 0 : i32
    return %c0_i32, %c0_i32_0 : i32, i32
  }
}

</mosaic_0001>

<bundles_post_ra>
// kernel: _diff_of_gaus_pallas.1
= control target key start
LH: loop header
LB: loop body
LE: loop exit
PB: predicated region body
PF: predicated region fallthrough
CT: control target
= control target key end

     0   :  { %7 = vsyncpa [#allocation3], 0  ;;  %s900_s0 = inlined_call_operand.hbm [shape: f32[2,4,16,16], index: 0, kind: input, shape index: {}]   ;;  %s901_s1 = inlined_call_operand.hbm [shape: f32[256,256], index: 1, kind: input, shape index: {}]   ;;  %s902_s2 = inlined_call_operand.vmem [shape: f32[8,256], index: 2, kind: output, shape index: {}]  }
   0x1   :  { %8 = vsyncpa [#allocation5], 0  ;;  %s765_s9 = smov [#allocation2]   ;;  %s717_s13 = scalar_lea.hbm %s900_s0, 2048 }
   0x2   :  { %s14_s10 = sshll.u32 %s765_s9, 4  ;;  %p718_p0 = scmp.ne.s32.totalorder %s900_s0, %s717_s13  ;;  %s15_s10 = int_to_ptr.vmem [resolvable:$true] %s14_s10 }
   0x3   :  { %p721_p1 = scmp.lt.u32.totalorder %s717_s13, %s900_s0 }
   0x5   :  { %p723_p2 = pnand %p721_p1, %p718_p0 }
   0x7   :  { %726 = shalt.err (!%p723_p2)
}
   0x8   :  { %s727_s18 = scalar_lea.vmem %s15_s10, 2048  ;;  %p732_p4 = scmp.lt.s32.totalorder %s15_s10, %s15_s10 }
   0x9   :  { %p728_p3 = scmp.ne.s32.totalorder %s15_s10, %s727_s18  ;;  %p733_p5 = scmp.lt.s32.totalorder %s727_s18, %s727_s18 }
   0xb   :  { %p734_p6 = por %p733_p5, %p732_p4 }
   0xd   :  { %p735_p7 = pnand %p734_p6, %p728_p3 }
   0xf   :  { %738 = shalt.err (!%p735_p7)
}
  0x10   :  { %s766_s19 = smov 128   ;;  %s767_s20 = smov 8  }
  0x11   :  { %20 = dma.hbm_to_vmem [thread:$0]  %s900_s0, 2048, %s15_s10, [#allocation3], %s766_s19, %s766_s19, %s767_s20  }
  0x12   :  { %s768_s23 = smov [#allocation4]   ;;  %s739_s27 = scalar_lea.hbm %s901_s1, 8192 }
  0x13   :  { %s26_s24 = sshll.u32 %s768_s23, 4  ;;  %p740_p8 = scmp.ne.s32.totalorder %s901_s1, %s739_s27  ;;  %s27_s24 = int_to_ptr.vmem [resolvable:$true] %s26_s24 }
  0x14   :  { %p743_p9 = scmp.lt.u32.totalorder %s739_s27, %s901_s1 }
  0x16   :  { %p745_p10 = pnand %p743_p9, %p740_p8 }
  0x18   :  { %748 = shalt.err (!%p745_p10)
}
  0x19   :  { %s749_s4 = scalar_lea.vmem %s27_s24, 8192  ;;  %p754_p12 = scmp.lt.s32.totalorder %s27_s24, %s27_s24 }
  0x1a   :  { %p750_p11 = scmp.ne.s32.totalorder %s27_s24, %s749_s4  ;;  %p755_p13 = scmp.lt.s32.totalorder %s749_s4, %s749_s4 }
  0x1c   :  { %p756_p0 = por %p755_p13, %p754_p12 }
  0x1e   :  { %p757_p1 = pnand %p756_p0, %p750_p11 }
  0x20   :  { %760 = shalt.err (!%p757_p1)
}
  0x21   :  { %s769_s0 = smov 256   ;;  %s770_s5 = smov 16  }
  0x22   :  { %32 = dma.hbm_to_vmem [thread:$0]  %s901_s1, 8192, %s27_s24, [#allocation5], %s769_s0, %s769_s0, %s770_s5  }
  0x23   :  { %761 = dma.done.wait [#allocation3], 2048  }
  0x24   :  { %762 = vsyncadd [#allocation3], 4294965248 }
  0x25   :  { %763 = dma.done.wait [#allocation5], 8192  }
  0x26   :  { %764 = vsyncadd [#allocation5], 4294959104  ;;  %v124_v0 = vlaneseq  ;;  %v771_v1 = vmov 1983009808   ;;  %v772_v3 = vmov 1934713408  }
  0x27   :  { %v122_v2 = vunpack.c.l.s4 %v771_v1  ;;  %v186_v4 = vunpack.c.l.s4 %v772_v3  ;;  %v103_v8 = vld [vmem:[#allocation2] sm:$0xff]  ;;  %v104_v9 = vld [vmem:[#allocation2 + $0x8] sm:$0xff]  ;;  %v105_v10 = vld [vmem:[#allocation2 + $0x10] sm:$0xff]  ;;  %s773_s1 = smov 48   ;;  %s774_s8 = smov 32   ;;  %vm447_vm0 = vcmask 130048  }
  0x28   :  { %v125_v6 = vshrl.u32 %v124_v0, 7  ;;  %v821_v12 = vld [vmem:[#allocation2 + $0x18] sm:$0xff]  ;;  %v107_v13 = vld [vmem:[#allocation2 + $0x20] sm:$0xff]  ;;  %v108_v14 = vld [vmem:[#allocation2 + $0x28] sm:$0xff]  ;;  %s775_s9 = smov 64   ;;  %s776_s10 = smov 80  }
  0x29   :  { %v123_v5 = vunpack.c.0.s8 %v122_v2  ;;  %v187_v7 = vunpack.c.0.s8 %v186_v4  ;;  %v109_v16 = vld [vmem:[#allocation2 + $0x30] sm:$0xff]  ;;  %v825_v17 = vld [vmem:[#allocation2 + $0x38] sm:$0xff]  ;;  %v111_v18 = vld [vmem:[#allocation2 + $0x40] sm:$0xff]  ;;  %v119_v19 = vcombine.low %v103_v8, %v107_v13  ;;  %v120_v20 = vcombine.high %v103_v8, %v107_v13  ;;  %s777_s11 = smov 96   ;;  %s778_s12 = smov 112  }
  0x2a   :  { %v255_v21 = vcombine.low %v104_v9, %v108_v14  ;;  %v256_v22 = vcombine.high %v104_v9, %v108_v14  ;;  %v112_v23 = vld [vmem:[#allocation2 + $0x48] sm:$0xff]  ;;  %v113_v24 = vld [vmem:[#allocation2 + $0x50] sm:$0xff]  ;;  %v114_v25 = vld [vmem:[#allocation2 + $0x58] sm:$0xff]  ;;  %v135_v26 = vcombine.low %v105_v10, %v109_v16  ;;  %v136_v27 = vcombine.high %v105_v10, %v109_v16 }
  0x2b   :  { %v819_v11 = vsub.s32 %v123_v5, %v125_v6  ;;  %v823_v15 = vsub.s32 %v187_v7, %v125_v6  ;;  %v271_v28 = vcombine.low %v821_v12, %v825_v17  ;;  %v272_v29 = vcombine.high %v821_v12, %v825_v17  ;;  %v115_v30 = vld [vmem:[#allocation2 + $0x60] sm:$0xff]  ;;  %v116_v31 = vld [vmem:[#allocation2 + $0x68] sm:$0xff]  ;;  %v117_v32 = vld [vmem:[#allocation2 + $0x70] sm:$0xff] }
  0x2c   :  { %v118_v37 = vld [vmem:[#allocation2 + $0x78] sm:$0xff]  ;;  %v151_v39 = vcombine.low %v111_v18, %v115_v30  ;;  %v152_v40 = vcombine.high %v111_v18, %v115_v30  ;;  %v167_v41 = vcombine.low %v113_v24, %v117_v32  ;;  %v168_v42 = vcombine.high %v113_v24, %v117_v32 }
  0x2d   :  { %v127_v33 = vrot.slane %v119_v19, %v819_v11  ;;  %v263_v34 = vrot.slane %v255_v21, %v819_v11  ;;  %v834_v35 = vrot.slane %v120_v20, %v819_v11  ;;  %v837_v36 = vrot.slane %v256_v22, %v819_v11  ;;  %v42_v30 = vld [vmem:[#allocation4 + $0x18] sm:$0xff] }
  0x2e   :  { %v143_v38 = vrot.slane %v135_v26, %v819_v11  ;;  %v279_v43 = vrot.slane %v271_v28, %v819_v11  ;;  %v287_v44 = vcombine.low %v112_v23, %v116_v31  ;;  %v288_v45 = vcombine.high %v112_v23, %v116_v31  ;;  %v40_v28 = vld [vmem:[#allocation4 + $0x8] sm:$0xff]  ;;  %v39_v31 = vld [vmem:[#allocation4] sm:$0xff] }
  0x2f   :  { %v159_v46 = vrot.slane %v151_v39, %v819_v11  ;;  %v175_v47 = vrot.slane %v167_v41, %v819_v11  ;;  %v303_v49 = vcombine.low %v114_v25, %v118_v37  ;;  %v304_v51 = vcombine.high %v114_v25, %v118_v37  ;;  %v41_v37 = vld [vmem:[#allocation4 + $0x10] sm:$0xff]  ;;  %v46_v39 = vld [vmem:[#allocation4 + $0x38] sm:$0xff] }
  0x30   :  { %v183_v48 = vcombine.low %v127_v33, %v143_v38  ;;  %v295_v50 = vrot.slane %v287_v44, %v819_v11  ;;  %v319_v52 = vcombine.low %v263_v34, %v279_v43  ;;  %v184_v53 = vcombine.high %v127_v33, %v143_v38  ;;  %v44_v38 = vld [vmem:[#allocation4 + $0x28] sm:$0xff] }
  0x31   :  { %v215_v55 = vcombine.low %v159_v46, %v175_v47  ;;  %v311_v56 = vrot.slane %v303_v49, %v819_v11  ;;  %v216_v57 = vcombine.high %v159_v46, %v175_v47  ;;  %v320_v60 = vcombine.high %v263_v34, %v279_v43  ;;  %v45_v47 = vld [vmem:[#allocation4 + $0x30] sm:$0xff]  ;;  %v50_v49 = vld [vmem:[#allocation4 + $0x58] sm:$0xff] }
  0x32   :  { %v845_v54 = vrot.slane %v183_v48, %v823_v15  ;;  %v849_v58 = vrot.slane %v319_v52, %v823_v15  ;;  %v198_v59 = vrot.slane %v184_v53, %v823_v15  ;;  %v150_v61 = vrot.slane %v136_v27, %v819_v11  ;;  %v48_v48 = vld [vmem:[#allocation4 + $0x48] sm:$0xff] }
  0x33   :  { %v854_v62 = vrot.slane %v215_v55, %v823_v15  ;;  %v351_v63 = vcombine.low %v295_v50, %v311_v56  ;;  %v230_v0 = vrot.slane %v216_v57, %v823_v15  ;;  %v352_v1 = vcombine.high %v295_v50, %v311_v56 }
  0x34   :  { %v334_v2 = vrot.slane %v320_v60, %v823_v15  ;;  %v166_v3 = vrot.slane %v152_v40, %v819_v11  ;;  %v182_v4 = vrot.slane %v168_v42, %v819_v11  ;;  %v199_v5 = vcombine.low %v834_v35, %v150_v61  ;;  %v43_v42 = vld [vmem:[#allocation4 + $0x20] sm:$0xff] }
  0x35   :  { %v248_v6 = vcombine.high %v845_v54, %v854_v62  ;;  %v864_v7 = vrot.slane %v351_v63, %v823_v15  ;;  %v247_v8 = vcombine.low %v845_v54, %v854_v62  ;;  %v250_v9 = vcombine.high %v198_v59, %v230_v0 }
  0x36   :  { %v366_v10 = vrot.slane %v352_v1, %v823_v15  ;;  %v249_v12 = vcombine.low %v198_v59, %v230_v0  ;;  %v207_v13 = vrot.slane %v199_v5, %v823_v15  ;;  %v231_v14 = vcombine.low %v166_v3, %v182_v4  ;;  %v54_v5 = vld [vmem:[#allocation4 + $0x78] sm:$0xff] }
  0x37   :  { %v383_v16 = vcombine.low %v849_v58, %v864_v7  ;;  %v384_v17 = vcombine.high %v849_v58, %v864_v7  ;;  %v286_v18 = vrot.slane %v272_v29, %v819_v11  ;;  %v302_v19 = vrot.slane %v288_v45, %v819_v11 }
  0x38   :  { %v386_v20 = vcombine.high %v334_v2, %v366_v10  ;;  %v385_v21 = vcombine.low %v334_v2, %v366_v10  ;;  %v239_v22 = vrot.slane %v231_v14, %v823_v15  ;;  %v318_v23 = vrot.slane %v304_v51, %v819_v11  ;;  %v47_v2 = vld [vmem:[#allocation4 + $0x40] sm:$0xff]  ;;  %v56_v14 = vld [vmem:[#allocation4 + $0x88] sm:$0xff] }
  0x39   :  { %v672_v24 = vpack.i.bf16 %v248_v6, %v384_v17  ;;  %v335_v25 = vcombine.low %v837_v36, %v286_v18  ;;  %v200_v26 = vcombine.high %v834_v35, %v150_v61  ;;  %v232_v27 = vcombine.high %v166_v3, %v182_v4  ;;  %v49_v3 = vld [vmem:[#allocation4 + $0x50] sm:$0xff]  ;;  %v52_v4 = vld [vmem:[#allocation4 + $0x68] sm:$0xff]  ;;  %v58_v17 = vld [vmem:[#allocation4 + $0x98] sm:$0xff] }
  0x3a   :  { %v682_v32 = vpack.i.bf16 %v250_v9, %v386_v20  ;;  %v677_v33 = vpack.i.bf16 %v249_v12, %v385_v21  ;;  %v251_v29 = vcombine.low %v207_v13, %v239_v22  ;;  %v367_v34 = vcombine.low %v302_v19, %v318_v23  ;;  %v51_v12 = vld [vmem:[#allocation4 + $0x60] sm:$0xff]  ;;  %v57_v21 = vld [vmem:[#allocation4 + $0x90] sm:$0xff] }
  0x3b   :  { %673 = vrot.lane.b32.xlu0 %v672_v24, %s770_s5  ;;  %v343_v11 = vrot.slane %v335_v25, %v823_v15  ;;  %v252_v40 = vcombine.high %v207_v13, %v239_v22  ;;  %v214_v41 = vrot.slane %v200_v26, %v823_v15  ;;  %v246_v35 = vrot.slane %v232_v27, %v823_v15  ;;  %v53_v13 = vld [vmem:[#allocation4 + $0x70] sm:$0xff]  ;;  %v55_v20 = vld [vmem:[#allocation4 + $0x80] sm:$0xff]  ;;  %v60_v22 = vld [vmem:[#allocation4 + $0xa8] sm:$0xff] }
  0x3c   :  { %683 = vrot.lane.b32.xlu1 %v682_v32, %s773_s1  ;;  %v375_v43 = vrot.slane %v367_v34, %v823_v15  ;;  %v336_v44 = vcombine.high %v837_v36, %v286_v18  ;;  %v368_v45 = vcombine.high %v302_v19, %v318_v23  ;;  %v594_v46 = vpack.c.bf16 %v42_v30, %v40_v28  ;;  %v62_v23 = vld [vmem:[#allocation4 + $0xb8] sm:$0xff]  ;;  %v59_v26 = vld [vmem:[#allocation4 + $0xa0] sm:$0xff]  ;;  %v61_v27 = vld [vmem:[#allocation4 + $0xb0] sm:$0xff] }
  0x3d   :  { %v253_v50 = vcombine.low %v214_v41, %v246_v35  ;;  %v596_v51 = vpack.c.bf16 %v41_v37, %v39_v31  ;;  %v598_v52 = vpack.c.bf16 %v46_v39, %v44_v38  ;;  %v254_v59 = vcombine.high %v214_v41, %v246_v35  ;;  %v64_v28 = vld [vmem:[#allocation4 + $0xc8] sm:$0xff]  ;;  %v66_v30 = vld [vmem:[#allocation4 + $0xd8] sm:$0xff] }
  0x3e   :  { %v387_v53 = vcombine.low %v343_v11, %v375_v43  ;;  %v388_v55 = vcombine.high %v343_v11, %v375_v43  ;;  %v350_v56 = vrot.slane %v336_v44, %v823_v15  ;;  %v382_v57 = vrot.slane %v368_v45, %v823_v15  ;;  %595 = vmatprep.subr.bf16.mxu0 %v594_v46  ;;  %v68_v34 = vld [vmem:[#allocation4 + $0xe8] sm:$0xff]  ;;  %v70_v37 = vld [vmem:[#allocation4 + $0xf8] sm:$0xff]  ;;  %v67_v11 = vld [vmem:[#allocation4 + $0xe0] sm:$0xff] }
  0x3f   :  { %678 = vrot.lane.b32.xlu0 %v677_v33, %s774_s8  ;;  %597 = vmatpush1.bf16.msra.mxu0 %v596_v51  ;;  %v600_v36 = vpack.c.bf16 %v45_v47, %v43_v42  ;;  %v602_v60 = vpack.c.bf16 %v50_v49, %v48_v48  ;;  %v604_v9 = vpack.c.bf16 %v49_v3, %v47_v2  ;;  %v63_v33 = vld [vmem:[#allocation4 + $0xc0] sm:$0xff]  ;;  %v72_v41 = vld [vmem:[#allocation4 + $0x108] sm:$0xff]  ;;  %v74_v35 = vld [vmem:[#allocation4 + $0x118] sm:$0xff]  ;;  %vm449_vm1 = vcmask 261120  }
  0x40   :  { %v687_v61 = vpack.i.bf16 %v251_v29, %v387_v53  ;;  %v692_v63 = vpack.i.bf16 %v252_v40, %v388_v55  ;;  %v389_v0 = vcombine.low %v350_v56, %v382_v57  ;;  %v390_v1 = vcombine.high %v350_v56, %v382_v57  ;;  %599 = vmatprep.subr.bf16.mxu0 %v598_v52  ;;  %v65_v29 = vld [vmem:[#allocation4 + $0xd0] sm:$0xff]  ;;  %v71_v44 = vld [vmem:[#allocation4 + $0x100] sm:$0xff]  ;;  %v76_v46 = vld [vmem:[#allocation4 + $0x128] sm:$0xff] }
  0x41   :  { %v606_v10 = vpack.c.bf16 %v54_v5, %v52_v4  ;;  %v608_v18 = vpack.c.bf16 %v53_v13, %v51_v12  ;;  %v610_v19 = vpack.c.bf16 %v58_v17, %v56_v14  ;;  %v612_v24 = vpack.c.bf16 %v57_v21, %v55_v20  ;;  %v69_v40 = vld [vmem:[#allocation4 + $0xf0] sm:$0xff]  ;;  %v78_v47 = vld [vmem:[#allocation4 + $0x138] sm:$0xff]  ;;  %v80_v52 = vld [vmem:[#allocation4 + $0x148] sm:$0xff] }
  0x42   :  { %688 = vrot.lane.b32.xlu1 %v687_v61, %s775_s9  ;;  %v697_v6 = vpack.i.bf16 %v253_v50, %v389_v0  ;;  %v702_v15 = vpack.i.bf16 %v254_v59, %v390_v1  ;;  %v614_v25 = vpack.c.bf16 %v62_v23, %v60_v22  ;;  %v616_v31 = vpack.c.bf16 %v61_v27, %v59_v26  ;;  %v73_v45 = vld [vmem:[#allocation4 + $0x110] sm:$0xff]  ;;  %v75_v50 = vld [vmem:[#allocation4 + $0x120] sm:$0xff]  ;;  %v82_v53 = vld [vmem:[#allocation4 + $0x158] sm:$0xff] }
  0x43   :  { %693 = vrot.lane.b32.xlu0 %v692_v63, %s776_s10  ;;  %601 = vmatpush1.bf16.msra.mxu0 %v600_v36  ;;  %v618_v32 = vpack.c.bf16 %v66_v30, %v64_v28  ;;  %v620_v38 = vpack.c.bf16 %v65_v29, %v63_v33  ;;  %v622_v39 = vpack.c.bf16 %v70_v37, %v68_v34  ;;  %v77_v51 = vld [vmem:[#allocation4 + $0x130] sm:$0xff]  ;;  %v79_v57 = vld [vmem:[#allocation4 + $0x140] sm:$0xff]  ;;  %v84_v36 = vld [vmem:[#allocation4 + $0x168] sm:$0xff]  ;;  %vm451_vm2 = vcmask 392192  }
  0x44   :  { %603 = vmatprep.subr.bf16.mxu0 %v602_v60  ;;  %v624_v42 = vpack.c.bf16 %v69_v40, %v67_v11  ;;  %v626_v43 = vpack.c.bf16 %v74_v35, %v72_v41  ;;  %v628_v48 = vpack.c.bf16 %v73_v45, %v71_v44  ;;  %v630_v49 = vpack.c.bf16 %v78_v47, %v76_v46  ;;  %v81_v59 = vld [vmem:[#allocation4 + $0x150] sm:$0xff]  ;;  %v86_v60 = vld [vmem:[#allocation4 + $0x178] sm:$0xff]  ;;  %v83_v0 = vld [vmem:[#allocation4 + $0x160] sm:$0xff] }
  0x45   :  { %v632_v55 = vpack.c.bf16 %v77_v51, %v75_v50  ;;  %v634_v56 = vpack.c.bf16 %v82_v53, %v80_v52  ;;  %v636_v61 = vpack.c.bf16 %v81_v59, %v79_v57  ;;  %v638_v63 = vpack.c.bf16 %v86_v60, %v84_v36  ;;  %v85_v1 = vld [vmem:[#allocation4 + $0x170] sm:$0xff]  ;;  %v88_v2 = vld [vmem:[#allocation4 + $0x188] sm:$0xff]  ;;  %v90_v3 = vld [vmem:[#allocation4 + $0x198] sm:$0xff] }
  0x46   :  { %698 = vrot.lane.b32.xlu1 %v697_v6, %s777_s11  ;;  %v640_v4 = vpack.c.bf16 %v85_v1, %v83_v0  ;;  %v642_v5 = vpack.c.bf16 %v90_v3, %v88_v2  ;;  %v87_v6 = vld [vmem:[#allocation4 + $0x180] sm:$0xff]  ;;  %v93_v17 = vld [vmem:[#allocation4 + $0x1b0] sm:$0xff]  ;;  %vm453_vm3 = vcmask 523264   ;;  %vm455_vm4 = vcmask 654336  }
  0x47   :  { %703 = vrot.lane.b32.xlu0 %v702_v15, %s778_s12  ;;  %605 = vmatpush1.bf16.msra.mxu0 %v604_v9  ;;  %v89_v15 = vld [vmem:[#allocation4 + $0x190] sm:$0xff]  ;;  %v92_v9 = vld [vmem:[#allocation4 + $0x1a8] sm:$0xff]  ;;  %v91_v14 = vld [vmem:[#allocation4 + $0x1a0] sm:$0xff]  ;;  %vm457_vm5 = vcmask 785408   ;;  %vm459_vm6 = vcmask 916480  }
  0x48   :  { %607 = vmatprep.subr.bf16.mxu0 %v606_v10  ;;  %v94_v10 = vld [vmem:[#allocation4 + $0x1b8] sm:$0xff]  ;;  %v644_v12 = vpack.c.bf16 %v89_v15, %v87_v6  ;;  %v648_v20 = vpack.c.bf16 %v93_v17, %v91_v14  ;;  %v95_v22 = vld [vmem:[#allocation4 + $0x1c0] sm:$0xff]  ;;  %v97_v23 = vld [vmem:[#allocation4 + $0x1d0] sm:$0xff] }
  0x49   :  { %v646_v13 = vpack.c.bf16 %v94_v10, %v92_v9  ;;  %v652_v26 = vpack.c.bf16 %v97_v23, %v95_v22  ;;  %v99_v28 = vld [vmem:[#allocation4 + $0x1e0] sm:$0xff]  ;;  %v101_v30 = vld [vmem:[#allocation4 + $0x1f0] sm:$0xff] }
  0x4b   :  { %609 = vmatpush1.bf16.msra.mxu0 %v608_v18  ;;  %v96_v18 = vld [vmem:[#allocation4 + $0x1c8] sm:$0xff] }
  0x4c   :  { %611 = vmatprep.subr.bf16.mxu0 %v610_v19  ;;  %v98_v19 = vld [vmem:[#allocation4 + $0x1d8] sm:$0xff] }
  0x4d   :  { %v650_v21 = vpack.c.bf16 %v98_v19, %v96_v18 }
  0x4f   :  { %613 = vmatpush1.bf16.msra.mxu0 %v612_v24  ;;  %v100_v24 = vld [vmem:[#allocation4 + $0x1e8] sm:$0xff] }
  0x50   :  { %615 = vmatprep.subr.bf16.mxu0 %v614_v25  ;;  %v102_v25 = vld [vmem:[#allocation4 + $0x1f8] sm:$0xff] }
  0x51   :  { %v654_v27 = vpack.c.bf16 %v102_v25, %v100_v24 }
  0x53   :  { %617 = vmatpush1.bf16.msra.mxu0 %v616_v31  ;;  %v656_v31 = vpack.c.bf16 %v101_v30, %v99_v28 }
  0x54   :  { %619 = vmatprep.subr.bf16.mxu0 %v618_v32 }
  0x57   :  { %621 = vmatpush1.bf16.msra.mxu0 %v620_v38 }
  0x58   :  { %623 = vmatprep.subr.bf16.mxu0 %v622_v39 }
  0x5b   :  { %625 = vmatpush1.bf16.msra.mxu0 %v624_v42 }
  0x5c   :  { %627 = vmatprep.subr.bf16.mxu0 %v626_v43 }
  0x5f   :  { %629 = vmatpush1.bf16.msra.mxu0 %v628_v48 }
  0x60   :  { %631 = vmatprep.subr.bf16.mxu0 %v630_v49 }
  0x63   :  { %633 = vmatpush1.bf16.msra.mxu0 %v632_v55 }
  0x64   :  { %635 = vmatprep.subr.bf16.mxu0 %v634_v56 }
  0x67   :  { %637 = vmatpush1.bf16.msra.mxu0 %v636_v61 }
  0x68   :  { %639 = vmatprep.subr.bf16.mxu0 %v638_v63 }
  0x6b   :  { %641 = vmatpush1.bf16.msra.mxu0 %v640_v4 }
  0x6c   :  { %643 = vmatprep.subr.bf16.mxu0 %v642_v5 }
  0x6f   :  { %645 = vmatpush1.bf16.msra.mxu0 %v644_v12 }
  0x70   :  { %647 = vmatprep.subr.bf16.mxu0 %v646_v13 }
  0x73   :  { %649 = vmatpush1.bf16.msra.mxu0 %v648_v20 }
  0x74   :  { %651 = vmatprep.subr.bf16.mxu0 %v650_v21 }
  0x77   :  { %653 = vmatpush1.bf16.msra.mxu0 %v652_v26 }
  0x78   :  { %655 = vmatprep.subr.bf16.mxu0 %v654_v27 }
  0x7b   :  { %657 = vmatpush1.bf16.msra.mxu0 %v656_v31 }
  0xad   :  { %v674_v32 = vpop.permute.xlu0 %673 }
  0xae   :  { %v684_v33 = vpop.permute.xlu1 %683  ;;  %v676_v29 = vunpack.i.h.bf16 %v674_v32  ;;  %v675_v34 = vunpack.i.l.bf16 %v674_v32 }
  0xaf   :  { %v686_v41 = vunpack.i.h.bf16 %v684_v33  ;;  %v685_v35 = vunpack.i.l.bf16 %v684_v33 }
  0xb0   :  { %v448_v11 = vsel %vm447_vm0, %v247_v8, %v676_v29  ;;  %v461_v40 = vsel %vm447_vm0, %v383_v16, %v675_v34 }
  0xb1   :  { %v679_v37 = vpop.permute.xlu0 %678 }
  0xb2   :  { %v681_v38 = vunpack.i.h.bf16 %v679_v37  ;;  %v680_v39 = vunpack.i.l.bf16 %v679_v37 }
  0xb4   :  { %v450_v42 = vsel %vm449_vm1, %v448_v11, %v681_v38  ;;  %v462_v43 = vsel %vm449_vm1, %v461_v40, %v680_v39  ;;  %v689_v44 = vpop.permute.xlu1 %688 }
  0xb5   :  { %v691_v45 = vunpack.i.h.bf16 %v689_v44  ;;  %v690_v46 = vunpack.i.l.bf16 %v689_v44  ;;  %v452_v47 = vsel %vm451_vm2, %v450_v42, %v686_v41  ;;  %v463_v48 = vsel %vm451_vm2, %v462_v43, %v685_v35  ;;  %v694_v49 = vpop.permute.xlu0 %693 }
  0xb6   :  { %v696_v50 = vunpack.i.h.bf16 %v694_v49  ;;  %v695_v51 = vunpack.i.l.bf16 %v694_v49 }
  0xb7   :  { %v454_v54 = vsel %vm453_vm3, %v452_v47, %v691_v45  ;;  %v464_v62 = vsel %vm453_vm3, %v463_v48, %v690_v46 }
  0xb8   :  { %v699_v8 = vpop.permute.xlu1 %698  ;;  %v465_v58 = vsel %vm455_vm4, %v464_v62, %v695_v51  ;;  %v456_v7 = vsel %vm455_vm4, %v454_v54, %v696_v50 }
  0xb9   :  { %v701_v16 = vunpack.i.h.bf16 %v699_v8  ;;  %v700_v52 = vunpack.i.l.bf16 %v699_v8  ;;  %v704_v53 = vpop.permute.xlu0 %703 }
  0xba   :  { %v706_v55 = vunpack.i.h.bf16 %v704_v53  ;;  %v705_v56 = vunpack.i.l.bf16 %v704_v53 }
  0xbb   :  { %v466_v57 = vsel %vm457_vm5, %v465_v58, %v700_v52  ;;  %v458_v59 = vsel %vm457_vm5, %v456_v7, %v701_v16 }
  0xbc   :  { %v467_v36 = vsel %vm459_vm6, %v466_v57, %v705_v56  ;;  %v460_v60 = vsel %vm459_vm6, %v458_v59, %v706_v55 }
  0xbd   :  { %532 = vmatprep.mubr.f32.mxu0 %v467_v36 }
  0xbe   :  { %533 = vmatmul.mubr.f32.vlgmr.msra.gmra.mrb[0].mxu0 %v460_v60 }
 0x191   :  { %v534_v61 = vpop.f32.mrb[0].mxu0 }
 0x192   :  { %v536_v63 = vpop.f32.mrb[1].mxu0 }
 0x193   :  { %v548_v0 = vmax.f32 %v534_v61, %v536_v63  ;;  %v539_v1 = vmin.f32 %v534_v61, %v536_v63 }
 0x195   :  { %549 = vmax.xlane.f32.xlu0 %v548_v0  ;;  %540 = vmin.xlane.f32.xlu1 %v539_v1 }
 0x222   :  { %v550_v2 = vpop.xlane.xlu0 %549  ;;  %v541_v3 = vpop.xlane.xlu1 %540 }
 0x223   :  { %v551_v4 = vrot.slane %v550_v2, 4  ;;  %v542_v5 = vrot.slane %v541_v3, 4 }
 0x225   :  { %v552_v6 = vmax.f32 %v550_v2, %v551_v4  ;;  %v543_v15 = vmin.f32 %v541_v3, %v542_v5 }
 0x227   :  { %v553_v9 = vrot.slane %v552_v6, 2  ;;  %v544_v10 = vrot.slane %v543_v15, 2 }
 0x229   :  { %v554_v12 = vmax.f32 %v552_v6, %v553_v9  ;;  %v545_v13 = vmin.f32 %v543_v15, %v544_v10 }
 0x22b   :  { %v555_v14 = vrot.slane %v554_v12, 1  ;;  %v546_v17 = vrot.slane %v545_v13, 1 }
 0x22d   :  { %v556_v18 = vmax.f32 %v554_v12, %v555_v14  ;;  %v547_v19 = vmin.f32 %v545_v13, %v546_v17 }
 0x22f   :  { %v557_v20 = vsub.f32 %v556_v18, %v547_v19  ;;  %v562_v22 = vsub.f32 %v534_v61, %v547_v19  ;;  %v563_v23 = vsub.f32 %v536_v63, %v547_v19 }
 0x231   :  { %707 = vrcp.f32 %v557_v20  ;;  %vm558_vm7 = vcmp.gt.f32.partialorder %v557_v20, 0.0 }
 0x23b   :  { %v708_v21 = vpop.eup %707 }
 0x23c   :  { %v561_v24 = vsel %vm558_vm7, %v708_v21, 0.0 }
 0x23d   :  { %v564_v25 = vmul.f32 %v562_v22, %v561_v24  ;;  %v565_v26 = vmul.f32 %v563_v23, %v561_v24 }
 0x23f   :  { %v568_v27 = vmax.f32 %v564_v25, 1e-30  ;;  %v569_v28 = vmax.f32 %v565_v26, 1e-30  ;;  %vm566_vm8 = vcmp.gt.f32.partialorder %v564_v25, 0.0  ;;  %vm567_vm9 = vcmp.gt.f32.partialorder %v565_v26, 0.0 }
 0x241   :  { %709 = vlog2.f32 %v568_v27 }
 0x242   :  { %711 = vlog2.f32 %v569_v28 }
 0x24b   :  { %v710_v30 = vpop.eup %709 }
 0x24c   :  { %v712_v31 = vpop.eup %711  ;;  %v571_v32 = vmul.f32 0.6931472, %v710_v30 }
 0x24d   :  { %v573_v33 = vmul.f32 0.6931472, %v712_v31 }
 0x24e   :  { %v574_v29 = vmul.f32 1.2, %v571_v32 }
 0x24f   :  { %v575_v34 = vmul.f32 1.2, %v573_v33 }
 0x250   :  { %v576_v37 = vmul.f32 1.442695, %v574_v29 }
 0x251   :  { %v578_v38 = vmul.f32 1.442695, %v575_v34 }
 0x252   :  { %713 = vpow2.f32 %v576_v37 }
 0x253   :  { %715 = vpow2.f32 %v578_v38 }
 0x25c   :  { %v714_v39 = vpop.eup %713 }
 0x25d   :  { %v716_v11 = vpop.eup %715  ;;  %v580_v40 = vsel %vm566_vm8, %v714_v39, 0.0 }
 0x25e   :  { %v581_v41 = vsel %vm567_vm9, %v716_v11, 0.0  ;;  %v582_v35 = vmax.f32 %v580_v40, 0.0 }
 0x25f   :  { %v583_v42 = vmax.f32 %v581_v41, 0.0 }
 0x260   :  { %v584_v43 = vmin.f32 %v582_v35, 1.0 }
 0x261   :  { %v585_v44 = vmin.f32 %v583_v42, 1.0 }
 0x262   :  { %586 = vst [vmem:[%s902_s2] sm:$0xff] %v584_v43 }
 0x263   :  { %587 = vst [vmem:[%s902_s2 + $0x8] sm:$0xff] %v585_v44 }
 0x264   :  { %592 = vsyncpa [#allocation3], 1 }
 0x265   :  { %593 = vsyncpa [#allocation5], 1 }

</bundles_post_ra>
